<compile_context>
chip_gen: v5e
topology: v5e:2x2
jax: 0.10.0
libtpu: 0.0.40
codegen_flags: <defaults>
</compile_context>

<pallas_src>
import jax
import jax.numpy as jnp
from jax import lax
from jax.experimental import pallas as pl
from jax.experimental.pallas import tpu as pltpu


def _conv1x1_kernel(x_ref, w_ref, b_ref, o_ref):
    # x_ref: (nb, C, tl) input dtype | w_ref: (O, C) bf16 | b_ref: (O, 1) f32
    # o_ref: (nb*O, tl) f32
    w = w_ref[...]
    out_ch = w.shape[0]
    tl = o_ref.shape[1]
    nb = x_ref.shape[0]
    # Hoisted once: JAX does not CSE broadcast_in_dim, so don't re-broadcast per batch.
    b_bcast = jnp.broadcast_to(b_ref[...], (out_ch, tl)).astype(jnp.float32)

    def body(n, carry):
        # Cast in VMEM right before the dot (VPU cast is free in this DMA-bound regime).
        x_n = x_ref[n].astype(jnp.bfloat16)                      # (C, tl)
        acc = jnp.dot(w, x_n, preferred_element_type=jnp.float32)  # (O, tl) on MXU, f32 acc
        o_ref[pl.ds(n * out_ch, out_ch), :] = (acc + b_bcast).astype(o_ref.dtype)
        return carry

    # fori_loop bounds live ranges; fully unroll small trip counts for LLO visibility.
    lax.fori_loop(0, nb, body, 0, unroll=(nb <= 8))


def _choose_tiles(N, O, C, Lp, elem_bytes, target_tile_bytes, max_nb=8):
    """Pick (nb, tl): batches per step and the L tile (multiple of 128 dividing Lp).

    Constraints:
      * nb divides N and the output block's leading dim (nb*O) is a multiple of 8
        or equals the full extent N*O (TPU sublane tiling rule).
      * Prefer configurations with >= 2 total grid steps (v7x megacore), then the
        largest activation tile that fits the per-step byte target.
    """
    valid_nb = [d for d in range(1, N + 1)
                if N % d == 0 and ((d * O) % 8 == 0 or d == N)]
    nbs = [d for d in valid_nb if d <= max_nb] or [min(valid_nb)]
    l_cands = [t for t in range(128, Lp + 1, 128) if Lp % t == 0]

    best = None
    for nb in nbs:
        for tl in l_cands:
            sz = nb * C * tl * elem_bytes
            multi = (N // nb) * (Lp // tl) >= 2
            if sz <= target_tile_bytes:
                key = (1, 1 if multi else 0, sz)    # fits: prefer multi-step, then biggest
            else:
                key = (0, -sz, 1 if multi else 0)   # too big: prefer smallest
            if best is None or key > best[0]:
                best = (key, nb, tl)
    _, nb, tl = best
    return nb, tl


def landmark_cls_forward(x, weight, bias, *, use_pallas=None):
    """Conv1d(k=1) + view(-1, num_classes).

    x: (N, C, L); weight: (O, C); bias: (O,).  Returns (N*L, O) f32.
    Note: like the PyTorch module, the final reshape pairs two adjacent L positions of
    the same class per output row (it reshapes the contiguous (N, O, L) tensor).
    """
    N, C, L = x.shape
    O = weight.shape[0]

    if use_pallas is None:
        # Tiny problems: plain XLA dot beats the fixed pallas_call overhead.
        use_pallas = N * C * L * jnp.dtype(x.dtype).itemsize >= (2 << 20)

    if not use_pallas:
        out3 = (jnp.einsum("oc,ncl->nol", weight.astype(jnp.float32), x.astype(jnp.float32))
                + bias.astype(jnp.float32)[None, :, None])
        return out3.reshape(-1, O)

    # Pad L up to a multiple of 128 so every tile is bounded (tail sliced off afterwards).
    Lp = ((L + 127) // 128) * 128
    if Lp != L:
        x = jnp.pad(x, ((0, 0), (0, 0), (0, Lp - L)))

    # Generation-aware tile / VMEM budgets.
    try:
        vmem_cap = int(pltpu.get_tpu_info().vmem_capacity_bytes)
    except Exception:
        vmem_cap = 128 << 20
    if vmem_cap >= (100 << 20):          # v5e / v6e: 128 MiB VMEM per TensorCore
        target_tile = 12 << 20
        vmem_clamp = 48 << 20
    else:                                # v7x: 64 MiB VMEM per TensorCore
        target_tile = 6 << 20
        vmem_clamp = 32 << 20

    elem_bytes = jnp.dtype(x.dtype).itemsize   # x streams in its native dtype (f32: 4 B)
    nb, tl = _choose_tiles(N, O, C, Lp, elem_bytes, target_tile)

    w_bf = weight.astype(jnp.bfloat16)                 # tiny, resident across the grid
    b2d = bias.reshape(O, 1).astype(jnp.float32)

    grid = (N // nb, Lp // tl)

    x_tile_b = nb * C * tl * elem_bytes
    o_tile_b = nb * O * tl * 4
    need = 2 * (x_tile_b + o_tile_b) + O * C * 2 + O * 4 + (4 << 20)
    vmem_limit = int(min(max(need, 16 << 20), vmem_clamp))

    cost = pl.CostEstimate(
        flops=2 * N * O * C * Lp,
        transcendentals=0,
        bytes_accessed=N * C * Lp * elem_bytes + O * C * 2 + N * O * Lp * 4,
    )

    out2d = pl.pallas_call(
        _conv1x1_kernel,
        out_shape=jax.ShapeDtypeStruct((N * O, Lp), jnp.float32),
        grid_spec=pltpu.PrefetchScalarGridSpec(
            num_scalar_prefetch=0,
            grid=grid,
            in_specs=[
                pl.BlockSpec((nb, C, tl), lambda i, j: (i, 0, j)),  # activation tile
                pl.BlockSpec((O, C), lambda i, j: (0, 0)),          # weight resident
                pl.BlockSpec((O, 1), lambda i, j: (0, 0)),          # bias resident
            ],
            out_specs=pl.BlockSpec((nb * O, tl), lambda i, j: (i, j)),  # lane-dense output
        ),
        compiler_params=pltpu.CompilerParams(
            dimension_semantics=("parallel", "parallel"),
            vmem_limit_bytes=vmem_limit,
        ),
        cost_estimate=cost,
    )(x, w_bf, b2d)

    if Lp != L:
        out2d = out2d.reshape(N, O, Lp)[:, :, :L].reshape(N * O, L)

    # (N*O, L) row-major == contiguous (N, O, L); reshape(-1, O) == torch's view(-1, 2).
    return out2d.reshape(-1, O)


if __name__ == "__main__":
    # Small shapes consistent with the module (inchannels scaled down from 1024, num_classes=2).
    N, C, L, O = 2, 256, 256, 2

    key = jax.random.PRNGKey(0)
    kx, kw = jax.random.split(key)

    x = jax.random.normal(kx, (N, C, L), dtype=jnp.float32)
    # Deterministic parameter init mirroring the module's __init__:
    #   nn.init.normal_(weight, std=0.001); nn.init.constant_(bias, 0)
    weight = 0.001 * jax.random.normal(kw, (O, C), dtype=jnp.float32)
    bias = jnp.zeros((O,), dtype=jnp.float32)

    # Force the Pallas path even at toy size so the kernel actually runs.
    out = landmark_cls_forward(x, weight, bias, use_pallas=True)
    out = jax.block_until_ready(out)

    # Pure-JAX reference of conv-1x1 + view(-1, 2).
    ref = (jnp.einsum("oc,ncl->nol", weight, x) + bias[None, :, None]).reshape(-1, O)
    assert out.shape == (N * L, O), out.shape
    # bf16 MXU inputs with f32 accumulation -> slightly loosened tolerance.
    assert jnp.allclose(out, ref, atol=2e-3, rtol=2e-2), float(jnp.max(jnp.abs(out - ref)))

    print("KERNEL_OK")
</pallas_src>

<mosaic_0001>
module attributes {stable_mosaic.version = 11 : i64} {
  func.func @_conv1x1_kernel(%arg0: i32, %arg1: i32, %arg2: memref<2x256x128xf32, #tpu.memory_space<vmem>>, %arg3: memref<2x256xbf16, #tpu.memory_space<vmem>>, %arg4: memref<2x1xf32, #tpu.memory_space<vmem>>, %arg5: memref<4x128xf32, #tpu.memory_space<vmem>>) attributes {dimension_semantics = [#tpu.dimension_semantics<parallel>, #tpu.dimension_semantics<parallel>], iteration_bounds = array<i64: 1, 2>, scalar_prefetch = 0 : i64, scratch_operands = 0 : i64, tpu.core_type = #tpu.core_type<tc>, window_params = [{transform_indices = @transform_0, window_bounds = array<i64: 2, 256, 128>}, {pipeline_mode = #tpu.pipeline_mode<synchronous>, transform_indices = @transform_1, window_bounds = array<i64: 2, 256>}, {pipeline_mode = #tpu.pipeline_mode<synchronous>, transform_indices = @transform_2, window_bounds = array<i64: 2, 1>}, {transform_indices = @transform_3, window_bounds = array<i64: 4, 128>}]} {
    %c0 = arith.constant 0 : index
    %c0_0 = arith.constant 0 : index
    %0 = vector.load %arg3[%c0, %c0_0] : memref<2x256xbf16, #tpu.memory_space<vmem>>, vector<2x256xbf16>
    %c0_1 = arith.constant 0 : index
    %c0_2 = arith.constant 0 : index
    %1 = vector.load %arg4[%c0_1, %c0_2] : memref<2x1xf32, #tpu.memory_space<vmem>>, vector<2x1xf32>
    %2 = vector.shape_cast %1 : vector<2x1xf32> to vector<2x1xf32>
    %3 = vector.broadcast %2 : vector<2x1xf32> to vector<2x128xf32>
    %c0_i32 = arith.constant 0 : i32
    %4 = arith.index_cast %c0_i32 : i32 to index
    %c0_3 = arith.constant 0 : index
    %c0_4 = arith.constant 0 : index
    %5 = vector.load %arg2[%4, %c0_3, %c0_4] : memref<2x256x128xf32, #tpu.memory_space<vmem>>, vector<1x256x128xf32>
    %6 = vector.shape_cast %5 : vector<1x256x128xf32> to vector<256x128xf32>
    %7 = arith.truncf %6 : vector<256x128xf32> to vector<256x128xbf16>
    %cst = arith.constant dense<0.000000e+00> : vector<2x128xf32>
    %8 = tpu.matmul %0, %7, %cst {dimension_numbers = #tpu.dot_dimension_numbers<[1], [0], [0], [1], [0, 0, 1, 1], [], []>} : vector<2x256xbf16>, vector<256x128xbf16>, vector<2x128xf32> -> vector<2x128xf32>
    %9 = arith.addf %8, %3 : vector<2x128xf32>
    %c2_i32 = arith.constant 2 : i32
    %10 = arith.muli %c0_i32, %c2_i32 : i32
    %11 = arith.index_cast %10 : i32 to index
    %c0_5 = arith.constant 0 : index
    %12 = vector.load %arg5[%11, %c0_5] : memref<4x128xf32, #tpu.memory_space<vmem>>, vector<2x128xf32>
    tpu.vector_store %arg5[%11, %c0_5], %9 {strides = array<i32>} : memref<4x128xf32, #tpu.memory_space<vmem>>, vector<2x128xf32>,
    %c1_i32 = arith.constant 1 : i32
    %13 = arith.index_cast %c1_i32 : i32 to index
    %c0_6 = arith.constant 0 : index
    %c0_7 = arith.constant 0 : index
    %14 = vector.load %arg2[%13, %c0_6, %c0_7] : memref<2x256x128xf32, #tpu.memory_space<vmem>>, vector<1x256x128xf32>
    %15 = vector.shape_cast %14 : vector<1x256x128xf32> to vector<256x128xf32>
    %16 = arith.truncf %15 : vector<256x128xf32> to vector<256x128xbf16>
    %cst_8 = arith.constant dense<0.000000e+00> : vector<2x128xf32>
    %17 = tpu.matmul %0, %16, %cst_8 {dimension_numbers = #tpu.dot_dimension_numbers<[1], [0], [0], [1], [0, 0, 1, 1], [], []>} : vector<2x256xbf16>, vector<256x128xbf16>, vector<2x128xf32> -> vector<2x128xf32>
    %18 = arith.addf %17, %3 : vector<2x128xf32>
    %c2_i32_9 = arith.constant 2 : i32
    %19 = arith.muli %c1_i32, %c2_i32_9 : i32
    %20 = arith.index_cast %19 : i32 to index
    %c0_10 = arith.constant 0 : index
    %21 = vector.load %arg5[%20, %c0_10] : memref<4x128xf32, #tpu.memory_space<vmem>>, vector<2x128xf32>
    tpu.vector_store %arg5[%20, %c0_10], %18 {strides = array<i32>} : memref<4x128xf32, #tpu.memory_space<vmem>>, vector<2x128xf32>,
    %c2_i32_11 = arith.constant 2 : i32
    return
  }
  func.func @transform_0(%arg0: i32, %arg1: i32) -> (i32, i32, i32) {
    %c0_i32 = arith.constant 0 : i32
    %c0_i32_0 = arith.constant 0 : i32
    return %arg0, %c0_i32, %arg1 : i32, i32, i32
  }
  func.func @transform_1(%arg0: i32, %arg1: i32) -> (i32, i32) {
    %c0_i32 = arith.constant 0 : i32
    %c0_i32_0 = arith.constant 0 : i32
    %c0_i32_1 = arith.constant 0 : i32
    return %c0_i32, %c0_i32_0 : i32, i32
  }
  func.func @transform_2(%arg0: i32, %arg1: i32) -> (i32, i32) {
    %c0_i32 = arith.constant 0 : i32
    %c0_i32_0 = arith.constant 0 : i32
    %c0_i32_1 = arith.constant 0 : i32
    return %c0_i32, %c0_i32_0 : i32, i32
  }
  func.func @transform_3(%arg0: i32, %arg1: i32) -> (i32, i32) {
    %c0_i32 = arith.constant 0 : i32
    return %arg0, %arg1 : i32, i32
  }
}

</mosaic_0001>

<bundles_post_ra>
// kernel: tpu_custom_call.1
= control target key start
LH: loop header
LB: loop body
LE: loop exit
PB: predicated region body
PF: predicated region fallthrough
CT: control target
= control target key end

     0   :  { %8 = vsyncpa [#allocation3], 0  ;;  %s922_s0 = inlined_call_operand.hbm [shape: f32[2,256,256], index: 0, kind: input, shape index: {}]   ;;  %s923_s1 = inlined_call_operand.vmem [shape: bf16[2,256], index: 1, kind: input, shape index: {}]   ;;  %s924_s2 = inlined_call_operand.vmem [shape: f32[2,1], index: 2, kind: input, shape index: {}]   ;;  %s925_s3 = inlined_call_operand.hbm [shape: f32[4,256], index: 3, kind: output, shape index: {}]  }
   0x1   :  { %10 = vsyncpa [#allocation3 + $0x1], 0 }
   0x2   :  { %11 = vsyncpa [#allocation4], 0 }
   0x3   :  { %13 = vsyncpa [#allocation4 + $0x1], 0  ;;  %s729_s12 = smov 0   ;;  %s731_s13 = smov 0  }
   0x4   :  { %s733_s14 = smov 0   ;;  %s735_s15 = smov 0  }
   0x5   :  { %s737_s16 = smov 0   ;;  %s739_s17 = smov 0  }
   0x6 LB: > { %s479_s18 = sadd.s32 4294967295, %s703_s17   ;;  %s480_s19 = sadd.s32 4294967294, %s703_s17   ;;  %s703_s17 = sphi %s739_s17, %s19_s17   ;;  %s699_s16 = sphi %s737_s16, %s934_s16   ;;  %s695_s15 = sphi %s735_s15, %s933_s15   ;;  %s691_s14 = sphi %s733_s14, %s932_s14   ;;  %s687_s13 = sphi %s731_s13, %s931_s13   ;;  %s683_s12 = sphi %s729_s12, %s930_s12  }
   0x7   : > { %s28_s20 = sadd.s32 1, %s699_s16  ;;  %s40_s21 = sadd.s32 1, %s691_s14 }
   0x8   : > { %p29_p0 = scmp.ge.s32.totalorder %s28_s20, 2  ;;  %p47_p1 = scmp.ne.s32.totalorder %s691_s14, %s687_s13 }
   0x9   : > { %p48_p2 = scmp.eq.s32.totalorder %s703_s17, 0  ;;  %p53_p3 = scmp.ne.s32.totalorder %s687_s13, %s683_s12 }
   0xa   : > { %s936_s20 = smov (%p29_p0, %s28_s20), 0  ;;  %p54_p5 = scmp.eq.s32.totalorder %s479_s18, 0 }
   0xb   : > { %p770_p4 = por %p48_p2, %p47_p1  ;;  %s36_s23 = ssub.s32 %s699_s16, %s936_s20 }
   0xc   : > { %p121_p6 = scmp.eq.s32.totalorder %s479_s18, 1  ;;  %p38_p7 = scmp.eq.s32.totalorder %s36_s23, 0 }
   0xd   : > { %p776_p8 = por %p54_p5, %p53_p3  ;;  %p127_p10 = scmp.eq.s32.totalorder %s480_s19, 1 }
   0xe   : > { %p780_p9 = por %p121_p6, %p47_p1  ;;  %p482_p12 = scmp.ge.s32.totalorder %s703_s17, 2 }
   0xf   : > { %s785_s26 = scalar_select %p38_p7, %s691_s14, %s40_s21  }
  0x10   : > { %p787_p11 = por %p127_p10, %p53_p3  ;;  %p536_p13 = scmp.lt.s32.totalorder %s703_s17, 2 }
  0x11   : > { %s153_s28 = sand.u32 1, %s691_s14   ;;  %s484_s30 = sshll.u32 %s699_s16, 3 }
  0x12   : > { %s483_s29 = sshll.u32 %s153_s28, 9  ;;  %s164_s6 = scalar_lea.hbm %s922_s0, %s484_s30 }
  0x13   : > { %s157_s7 = scalar_lea.vmem [#allocation2], %s483_s29  ;;  %s165_s9 = sshll.u32 %s164_s6, 4  ;;  %s166_s9 = int_to_ptr.hbm [resolvable:$true] %s165_s9 }
  0x14   : > { %s167_s8 = sshll.u32 %s157_s7, 4  ;;  %p529_p0 = pnand %p536_p13, %p770_p4  ;;  %s168_s8 = int_to_ptr.vmem [resolvable:$true] %s167_s8 }
  0x15   : > { %s154_s10 = scalar_lea.sflag [#allocation3], %s153_s28  ;;  %s705_s11 = smov 256  }
  0x16   : > { %s706_s18 = smov 128   ;;  %s707_s19 = smov 8  }
  0x17   : > { %531 = dma.hbm_to_vmem [thread:$0]  (!%p529_p0), %s166_s9, 8192, %s168_s8, %s154_s10, %s705_s11, %s706_s18, %s707_s19  }
  0x18   : > { %p485_p1 = scmp.ge.s32.totalorder %s703_s17, 1  ;;  %p175_p2 = scmp.lt.s32.totalorder %s703_s17, 3 }
  0x1a   : > { %p176_p3 = pnand %p485_p1, %p175_p2 }
  0x1b   : > { %s803_s21 = sand.u32 (!%p176_p3), 1, %s687_s13  }
  0x1c   : > { %179 = sbr.rel (%p176_p3) target bundleno = 211 (0xd3), region = 32  ;;  %s486_s23 = sshll.u32 (!%p176_p3), %s803_s21, 9 }
  0x1d   : > { %s182_s29 = scalar_lea.sflag (!%p176_p3), [#allocation3], %s803_s21  ;;  %s807_s30 = scalar_lea.vmem (!%p176_p3), [#allocation2], %s486_s23 }
  0x21   : > { %674 = dma.done.wait (%p776_p8), %s182_s29, 8192  }
  0x22   : > { %676 = vsyncadd (%p776_p8), %s182_s29, 4294959104  ;;  %v231_v0 = vld [vmem:[%s807_s30 + $0x70] sm:$0xff]  ;;  %v232_v1 = vld [vmem:[%s807_s30 + $0x78] sm:$0xff]  ;;  %v708_v33 = vmov 0   ;;  %s487_s5 = sshll.u32 %s803_s21, 2  ;;  %s521_s6 = sshll.u32 %s695_s15, 2 }
  0x23   : > { %v247_v2 = vld [vmem:[%s807_s30 + $0xf0] sm:$0xff]  ;;  %v256_v3 = vpack.c.bf16 %v232_v1, %v231_v0  ;;  %v248_v4 = vld [vmem:[%s807_s30 + $0xf8] sm:$0xff]  ;;  %v229_v11 = vld [vmem:[%s807_s30 + $0x60] sm:$0xff]  ;;  %590 = vset.pattern.permute.xlu0 %v708_v33  ;;  %s208_s7 = scalar_lea.vmem [#allocation5], %s487_s5  ;;  %s392_s10 = scalar_lea.hbm %s925_s3, %s521_s6 }
  0x24   : > { %v502_v5 = vld [vmem:[%s807_s30 + $0x170] sm:$0xff]  ;;  %v503_v6 = vld [vmem:[%s807_s30 + $0x178] sm:$0xff]  ;;  %v264_v7 = vpack.c.bf16 %v248_v4, %v247_v2  ;;  %v230_v13 = vld [vmem:[%s807_s30 + $0x68] sm:$0xff]  ;;  %s394_s11 = sshll.u32 %s208_s7, 4  ;;  %s396_s18 = sshll.u32 %s392_s10, 4  ;;  %s395_s11 = int_to_ptr.vmem [resolvable:$true] %s394_s11  ;;  %s397_s18 = int_to_ptr.hbm [resolvable:$true] %s396_s18 }
  0x25   : > { %v338_v8 = vpack.c.bf16 %v503_v6, %v502_v5  ;;  %v518_v9 = vld [vmem:[%s807_s30 + $0x1f0] sm:$0xff]  ;;  %v519_v10 = vld [vmem:[%s807_s30 + $0x1f8] sm:$0xff]  ;;  %271 = vmatpush.bf16.msra.mxu0 %v256_v3  ;;  %v245_v14 = vld [vmem:[%s807_s30 + $0xe0] sm:$0xff]  ;;  %v255_v16 = vpack.c.bf16 %v230_v13, %v229_v11  ;;  %s380_s19 = scalar_lea.sflag [#allocation4], %s803_s21  ;;  %s635_s15 = sshra.s32 %s397_s18, 4  ;;  %s636_s15 = int_to_ptr.hbm [resolvable:$true] %s635_s15 }
  0x26   : > { %v346_v12 = vpack.c.bf16 %v519_v10, %v518_v9  ;;  %v246_v15 = vld [vmem:[%s807_s30 + $0xe8] sm:$0xff]  ;;  %284 = vmatpush.bf16.msra.mxu1 %v264_v7  ;;  %v500_v18 = vld [vmem:[%s807_s30 + $0x160] sm:$0xff]  ;;  %v227_v23 = vld [vmem:[%s807_s30 + $0x50] sm:$0xff]  ;;  %s637_s23 = scalar_lea.hbm %s636_s15, 4  ;;  %s641_s22 = scalar_lea.hbm %s925_s3, 8 }
  0x27   : > { %352 = vmatpush.bf16.msra.mxu2 %v338_v8  ;;  %v263_v17 = vpack.c.bf16 %v246_v15, %v245_v14  ;;  %v501_v19 = vld [vmem:[%s807_s30 + $0x168] sm:$0xff]  ;;  %v516_v20 = vld [vmem:[%s807_s30 + $0x1e0] sm:$0xff]  ;;  %v228_v24 = vld [vmem:[%s807_s30 + $0x58] sm:$0xff]  ;;  %p638_p4 = scmp.ne.s32.totalorder %s636_s15, %s637_s23  ;;  %p642_p7 = scmp.lt.s32.totalorder %s636_s15, %s925_s3 }
  0x28   : > { %365 = vmatpush.bf16.msra.mxu3 %v346_v12  ;;  %v337_v21 = vpack.c.bf16 %v501_v19, %v500_v18  ;;  %v517_v22 = vld [vmem:[%s807_s30 + $0x1e8] sm:$0xff]  ;;  %v243_v26 = vld [vmem:[%s807_s30 + $0xd0] sm:$0xff]  ;;  %v244_v27 = vld [vmem:[%s807_s30 + $0xd8] sm:$0xff]  ;;  %v254_v29 = vpack.c.bf16 %v228_v24, %v227_v23  ;;  %p643_p8 = scmp.lt.s32.totalorder %s641_s22, %s637_s23 }
  0x29   : > { %v345_v25 = vpack.c.bf16 %v517_v22, %v516_v20  ;;  %v498_v28 = vld [vmem:[%s807_s30 + $0x150] sm:$0xff]  ;;  %272 = vmatpush.bf16.msra.mxu0 %v255_v16  ;;  %v499_v30 = vld [vmem:[%s807_s30 + $0x158] sm:$0xff]  ;;  %v262_v34 = vpack.c.bf16 %v244_v27, %v243_v26  ;;  %v225_v36 = vld [vmem:[%s807_s30 + $0x40] sm:$0xff]  ;;  %p639_p5 = pnand %p638_p4, %p780_p9 }
  0x2a   : > { %v514_v31 = vld [vmem:[%s807_s30 + $0x1d0] sm:$0xff]  ;;  %v515_v32 = vld [vmem:[%s807_s30 + $0x1d8] sm:$0xff]  ;;  %285 = vmatpush.bf16.msra.mxu1 %v263_v17  ;;  %v336_v35 = vpack.c.bf16 %v499_v30, %v498_v28  ;;  %v226_v37 = vld [vmem:[%s807_s30 + $0x48] sm:$0xff]  ;;  %p644_p10 = por %p643_p8, %p642_p7 }
  0x2b   : > { %353 = vmatpush.bf16.msra.mxu2 %v337_v21  ;;  %v241_v38 = vld [vmem:[%s807_s30 + $0xc0] sm:$0xff]  ;;  %v344_v39 = vpack.c.bf16 %v515_v32, %v514_v31  ;;  %v242_v40 = vld [vmem:[%s807_s30 + $0xc8] sm:$0xff]  ;;  %v253_v45 = vpack.c.bf16 %v226_v37, %v225_v36  ;;  %v223_v48 = vld [vmem:[%s807_s30 + $0x30] sm:$0xff]  ;;  %p640_p6 = pneg %p639_p5 }
  0x2c   : > { %366 = vmatpush.bf16.msra.mxu3 %v345_v25  ;;  %v496_v41 = vld [vmem:[%s807_s30 + $0x140] sm:$0xff]  ;;  %v497_v42 = vld [vmem:[%s807_s30 + $0x148] sm:$0xff]  ;;  %v261_v46 = vpack.c.bf16 %v242_v40, %v241_v38  ;;  %v224_v49 = vld [vmem:[%s807_s30 + $0x38] sm:$0xff] }
  0x2d   : > { %v512_v43 = vld [vmem:[%s807_s30 + $0x1c0] sm:$0xff]  ;;  %v513_v44 = vld [vmem:[%s807_s30 + $0x1c8] sm:$0xff]  ;;  %273 = vmatpush.bf16.msra.mxu0 %v254_v29  ;;  %v335_v47 = vpack.c.bf16 %v497_v42, %v496_v41  ;;  %v239_v50 = vld [vmem:[%s807_s30 + $0xb0] sm:$0xff]  ;;  %v252_v57 = vpack.c.bf16 %v224_v49, %v223_v48  ;;  %p645_p13 = pnand %p644_p10, %p640_p6 }
  0x2e   : > { %286 = vmatpush.bf16.msra.mxu1 %v262_v34  ;;  %v343_v51 = vpack.c.bf16 %v513_v44, %v512_v43  ;;  %v240_v52 = vld [vmem:[%s807_s30 + $0xb8] sm:$0xff]  ;;  %v494_v53 = vld [vmem:[%s807_s30 + $0x130] sm:$0xff]  ;;  %v221_v60 = vld [vmem:[%s807_s30 + $0x20] sm:$0xff] }
  0x2f   : > { %354 = vmatpush.bf16.msra.mxu2 %v336_v35  ;;  %v495_v54 = vld [vmem:[%s807_s30 + $0x138] sm:$0xff]  ;;  %v510_v55 = vld [vmem:[%s807_s30 + $0x1b0] sm:$0xff]  ;;  %v260_v58 = vpack.c.bf16 %v240_v52, %v239_v50  ;;  %v222_v61 = vld [vmem:[%s807_s30 + $0x28] sm:$0xff] }
  0x30   : > { %367 = vmatpush.bf16.msra.mxu3 %v344_v39  ;;  %v511_v56 = vld [vmem:[%s807_s30 + $0x1b8] sm:$0xff]  ;;  %v334_v59 = vpack.c.bf16 %v495_v54, %v494_v53  ;;  %v237_v62 = vld [vmem:[%s807_s30 + $0xa0] sm:$0xff]  ;;  %v238_v0 = vld [vmem:[%s807_s30 + $0xa8] sm:$0xff]  ;;  %v251_v5 = vpack.c.bf16 %v222_v61, %v221_v60 }
  0x31   : > { %274 = vmatpush.bf16.msra.mxu0 %v253_v45  ;;  %v342_v63 = vpack.c.bf16 %v511_v56, %v510_v55  ;;  %v492_v1 = vld [vmem:[%s807_s30 + $0x120] sm:$0xff]  ;;  %v493_v2 = vld [vmem:[%s807_s30 + $0x128] sm:$0xff]  ;;  %v219_v6 = vld [vmem:[%s807_s30 + $0x10] sm:$0xff]  ;;  %v259_v8 = vpack.c.bf16 %v238_v0, %v237_v62 }
  0x32   : > { %287 = vmatpush.bf16.msra.mxu1 %v261_v46  ;;  %v508_v3 = vld [vmem:[%s807_s30 + $0x1a0] sm:$0xff]  ;;  %v509_v4 = vld [vmem:[%s807_s30 + $0x1a8] sm:$0xff]  ;;  %v220_v7 = vld [vmem:[%s807_s30 + $0x18] sm:$0xff]  ;;  %v333_v9 = vpack.c.bf16 %v493_v2, %v492_v1 }
  0x33   : > { %355 = vmatpush.bf16.msra.mxu2 %v335_v47  ;;  %v235_v10 = vld [vmem:[%s807_s30 + $0x90] sm:$0xff]  ;;  %v236_v11 = vld [vmem:[%s807_s30 + $0x98] sm:$0xff]  ;;  %v341_v13 = vpack.c.bf16 %v509_v4, %v508_v3  ;;  %v250_v19 = vpack.c.bf16 %v220_v7, %v219_v6  ;;  %v217_v22 = vld [vmem:[%s807_s30] sm:$0xff] }
  0x34   : > { %368 = vmatpush.bf16.msra.mxu3 %v343_v51  ;;  %v490_v12 = vld [vmem:[%s807_s30 + $0x110] sm:$0xff]  ;;  %v491_v14 = vld [vmem:[%s807_s30 + $0x118] sm:$0xff]  ;;  %v258_v20 = vpack.c.bf16 %v236_v11, %v235_v10  ;;  %v218_v23 = vld [vmem:[%s807_s30 + $0x8] sm:$0xff] }
  0x35   : > { %275 = vmatpush.bf16.msra.mxu0 %v252_v57  ;;  %v210_v15 = vld [vmem:[%s923_s1] sm:$0x3]  ;;  %v506_v17 = vld [vmem:[%s807_s30 + $0x190] sm:$0xff]  ;;  %v332_v21 = vpack.c.bf16 %v491_v14, %v490_v12  ;;  %v233_v24 = vld [vmem:[%s807_s30 + $0x80] sm:$0xff]  ;;  %v249_v31 = vpack.c.bf16 %v218_v23, %v217_v22 }
  0x36   : > { %288 = vmatpush.bf16.msra.mxu1 %v260_v58  ;;  %v211_v16 = vld [vmem:[%s924_s2] sm:$0x3]  ;;  %266 = vst [vmem:[#allocation1] ss:$9 sm:$0xff] %v210_v15  ;;  %v234_v26 = vld [vmem:[%s807_s30 + $0x88] sm:$0xff]  ;;  %v488_v27 = vld [vmem:[%s807_s30 + $0x100] sm:$0xff] }
  0x37   : > { %356 = vmatpush.bf16.msra.mxu2 %v334_v59  ;;  %v507_v18 = vld [vmem:[%s807_s30 + $0x198] sm:$0xff]  ;;  %214 = vperm.xlu0 %590, %v211_v16   ;;  %v489_v28 = vld [vmem:[%s807_s30 + $0x108] sm:$0xff]  ;;  %v504_v29 = vld [vmem:[%s807_s30 + $0x180] sm:$0xff]  ;;  %v257_v32 = vpack.c.bf16 %v234_v26, %v233_v24 }
  0x38   : > { %369 = vmatpush.bf16.msra.mxu3 %v342_v63  ;;  %v340_v25 = vpack.c.bf16 %v507_v18, %v506_v17  ;;  %v505_v30 = vld [vmem:[%s807_s30 + $0x188] sm:$0xff]  ;;  %v331_v33 = vpack.c.bf16 %v489_v28, %v488_v27 }
  0x39   : > { %276 = vmatpush.bf16.msra.mxu0 %v251_v5  ;;  %v339_v34 = vpack.c.bf16 %v505_v30, %v504_v29 }
  0x3a   : > { %289 = vmatpush.bf16.msra.mxu1 %v259_v8 }
  0x3b   : > { %357 = vmatpush.bf16.msra.mxu2 %v333_v9 }
  0x3c   : > { %370 = vmatpush.bf16.msra.mxu3 %v341_v13 }
  0x3d   : > { %277 = vmatpush.bf16.msra.mxu0 %v250_v19  ;;  %v267_v35 = vld [vmem:[#allocation1] sm:$0xff]  ;;  %v268_v36 = vld [vmem:[#allocation1 + $0x9] sm:$0xff] }
  0x3e   : > { %290 = vmatpush.bf16.msra.mxu1 %v258_v20  ;;  %347 = vst [vmem:[#allocation1] ss:$9 sm:$0xff] %v210_v15 }
  0x3f   : > { %358 = vmatpush.bf16.msra.mxu2 %v332_v21 }
  0x40   : > { %371 = vmatpush.bf16.msra.mxu3 %v340_v25 }
  0x41   : > { %278 = vmatpush.bf16.msra.mxu0 %v249_v31 }
  0x42   : > { %291 = vmatpush.bf16.msra.mxu1 %v257_v32 }
  0x43   : > { %359 = vmatpush.bf16.msra.mxu2 %v331_v33 }
  0x44   : > { %372 = vmatpush.bf16.msra.mxu3 %v339_v34  ;;  %279 = vmatmul.bf16.vlgmr.msra.gmra.mxu0 %v267_v35 }
  0x45   : > { %292 = vmatmul.bf16.vlgmr.msra.gmra.mxu1 %v268_v36  ;;  %v348_v37 = vld [vmem:[#allocation1] sm:$0xff]  ;;  %v349_v38 = vld [vmem:[#allocation1 + $0x9] sm:$0xff] }
  0x46   : > { %360 = vmatmul.bf16.vlgmr.msra.gmra.mxu2 %v348_v37 }
  0x47   : > { %373 = vmatmul.bf16.vlgmr.msra.gmra.mxu3 %v349_v38 }
  0xa9   : > { %v215_v39 = vpop.permute.xlu0 %214 }
  0xc1   : > { %v280_v40 = vpop.f32.mrf.mxu0 }
  0xc2   : > { %v293_v41 = vpop.f32.mrf.mxu1  ;;  %v281_v42 = vadd.f32 %v280_v40, %v215_v39 }
  0xc4   : > { %v294_v43 = vadd.f32 %v293_v41, %v281_v42 }
  0xc6   : > { %297 = vst [vmem:[%s208_s7] sm:$0x3] %v294_v43 }
  0xc9   : > { %v282_v44 = vpop.f32.mrf.mxu0  ;;  %v361_v46 = vpop.f32.mrf.mxu2 }
  0xca   : > { %v295_v45 = vpop.f32.mrf.mxu1  ;;  %v374_v47 = vpop.f32.mrf.mxu3  ;;  %v362_v48 = vadd.f32 %v361_v46, %v215_v39 }
  0xcc   : > { %v375_v49 = vadd.f32 %v374_v47, %v362_v48 }
  0xce   : > { %378 = vst [vmem:[%s208_s7 + $0x2] sm:$0x3] %v375_v49 }
  0xcf   : > { %648 = shalt.err (!%p645_p13)
}
  0xd0   : > { %526 = dma.vmem_to_hbm [thread:$0]  (%p780_p9), %s395_s11, 64, %s397_s18, %s380_s19  }
  0xd1   : > { %v363_v50 = vpop.f32.mrf.mxu2 }
  0xd2   : > { %v376_v51 = vpop.f32.mrf.mxu3 }
  0xd3 PF: > { %s408_s21 = sand.u32 1, %s683_s12   ;;  %p533_p0 = pnand %p482_p12, %p787_p11 }
  0xd4   : > { %s409_s4 = scalar_lea.sflag [#allocation4], %s408_s21 }
  0xd5   : > { %p534_p1 = pneg %p533_p0 }
  0xd7   : > { %678 = dma.done.wait (%p534_p1), %s409_s4, 64  }
  0xd8   : > { %680 = vsyncadd (%p534_p1), %s409_s4, 4294967232  ;;  %s19_s17 = sadd.s32 1, %s703_s17   ;;  %s930_s12 = smov %s687_s13 }
  0xd9   : > { %p16_p2 = scmp.ge.s32.totalorder %s19_s17, 4   ;;  %s931_s13 = smov %s691_s14 }
  0xda   : > { %s932_s14 = smov %s785_s26  ;;  %s933_s15 = smov %s699_s16 }
  0xdb   : > { %s934_s16 = smov %s936_s20  ;;  %18 = sbr.rel (!%p16_p2) target bundleno = 6 (0x6), region = 78 }
  0xe0   :  { %415 = vsyncpa [#allocation3], 1 }
  0xe1   :  { %417 = vsyncpa [#allocation3 + $0x1], 1 }
  0xe2   :  { %418 = vsyncpa [#allocation4], 1 }
  0xe3   :  { %420 = vsyncpa [#allocation4 + $0x1], 1 }

</bundles_post_ra>
